<compile_context>
chip_gen: v5e
topology: v5e:2x2
jax: 0.10.0
libtpu: 0.0.40
codegen_flags: <defaults>
</compile_context>

<pallas_src>
import math

import jax
import jax.numpy as jnp
from jax.experimental import pallas as pl
from jax.experimental.pallas import tpu as pltpu

_EPS = 1e-5                      # PyTorch BatchNorm1d default eps
_VMEM_LIMIT = 32 * 1024 * 1024   # explicit: v5e's default scoped VMEM is 16 MiB


# ---------------------------------------------------------------------------
# Conv1d (stride 1, "same" padding) + per-batch BN partial statistics.
# ---------------------------------------------------------------------------
def _make_conv_stats_kernel(K, L, C_in):
    pad = K // 2

    def kernel(x_ref, w_ref, b_ref, o_ref, s_ref):
        # x_ref: (C_in, L)          (batch dim squeezed)
        # w_ref: (C_out, K*C_in)    (tap-major rows along contraction)
        # b_ref: (C_out, 1)
        # o_ref: (C_out, L)
        # s_ref: (C_out, 2)         f32 (sum, sumsq) over L for this batch
        x = x_ref[...]                              # keep native dtype for MXU
        parts = []
        for k in range(K):                          # K is static (1 or 3)
            off = k - pad
            if off < 0:
                z = jnp.zeros((C_in, -off), x.dtype)
                part = jnp.concatenate([z, x[:, : L + off]], axis=1)
            elif off > 0:
                z = jnp.zeros((C_in, off), x.dtype)
                part = jnp.concatenate([x[:, off:], z], axis=1)
            else:
                part = x
            parts.append(part)
        rhs = parts[0] if K == 1 else jnp.concatenate(parts, axis=0)  # (K*C_in, L)

        acc = jnp.dot(w_ref[...], rhs, preferred_element_type=jnp.float32)
        acc = acc + b_ref[...].astype(jnp.float32)
        o_ref[...] = acc.astype(o_ref.dtype)

        # BN partials while the activation is still in vregs (saves one full
        # HBM read of h in the BatchNorm kernel).
        s = jnp.sum(acc, axis=1, keepdims=True)
        sq = jnp.sum(acc * acc, axis=1, keepdims=True)
        s_ref[...] = jnp.concatenate([s, sq], axis=1)

    return kernel


def conv1d_stats_pallas(x, w, b):
    """x: (B, C_in, L), w: (C_out, C_in, K), b: (C_out,)
    -> (h: (B, C_out, L), stats: (B, C_out, 2) f32 per-batch (sum, sumsq))."""
    B, C_in, L = x.shape
    C_out, _, K = w.shape
    # (C_out, C_in, K) -> (C_out, K, C_in) -> (C_out, K*C_in): row block k of the
    # contraction matches the tap-k rows of the in-kernel rhs.
    w_flat = jnp.transpose(w, (0, 2, 1)).reshape(C_out, K * C_in)
    b2 = b.reshape(C_out, 1)

    # TODO(synk): for very long sequences also tile L with halo tiles; per-batch
    # full-length blocks fit comfortably under the 32 MiB limit at UNet-1D sizes.
    return pl.pallas_call(
        _make_conv_stats_kernel(K, L, C_in),
        out_shape=(jax.ShapeDtypeStruct((B, C_out, L), x.dtype),
                   jax.ShapeDtypeStruct((B, C_out, 2), jnp.float32)),
        grid_spec=pltpu.PrefetchScalarGridSpec(
            num_scalar_prefetch=0,
            grid=(B,),
            in_specs=[
                pl.BlockSpec((None, C_in, L), lambda i: (i, 0, 0)),
                pl.BlockSpec((C_out, K * C_in), lambda i: (0, 0)),
                pl.BlockSpec((C_out, 1), lambda i: (0, 0)),
            ],
            out_specs=[
                pl.BlockSpec((None, C_out, L), lambda i: (i, 0, 0)),
                pl.BlockSpec((None, C_out, 2), lambda i: (i, 0, 0)),
            ],
        ),
        compiler_params=pltpu.CompilerParams(
            dimension_semantics=("parallel",),
            vmem_limit_bytes=_VMEM_LIMIT,
        ),
    )(x, w_flat, b2)


# ---------------------------------------------------------------------------
# Fused folded-BatchNorm affine + SiLU (+ residual: identity or 1x1 conv).
# Single streamed pass over h; all per-channel math pre-folded in the wrapper.
# ---------------------------------------------------------------------------
def _make_bn_silu_kernel(mode):
    """mode: 'plain' | 'res_identity' | 'res_conv'."""

    def kernel(*refs):
        if mode == "plain":
            h_ref, sc_ref, sh_ref, o_ref = refs
        elif mode == "res_identity":
            h_ref, sc_ref, sh_ref, r_ref, o_ref = refs
        else:  # res_conv
            h_ref, sc_ref, sh_ref, x_ref, wr_ref, br_ref, o_ref = refs

        h = h_ref[...].astype(jnp.float32)                    # (c_tile, l_tile)
        y = h * sc_ref[...] + sh_ref[...]                     # folded BN(+time)
        # SiLU: y * sigmoid(y); the reciprocal goes to the EUP slot (free-ish).
        y = y * pl.reciprocal(1.0 + jnp.exp(-y), approx=True)

        if mode == "res_identity":
            y = y + r_ref[...].astype(jnp.float32)
        elif mode == "res_conv":
            # 1x1 residual conv on the MXU; tiny matmul hides under the DMA.
            res = jnp.dot(wr_ref[...], x_ref[...],
                          preferred_element_type=jnp.float32)
            y = y + res + br_ref[...].astype(jnp.float32)

        o_ref[...] = y.astype(o_ref.dtype)

    return kernel


def _pick_c_tile(C):
    # Largest power-of-two multiple of 8 that divides C while leaving >= 2
    # channel tiles (keeps both v7x TensorCores busy); else the full extent.
    for cand in (256, 128, 64, 32, 16, 8):
        if cand < C and C % cand == 0:
            return cand
    return C


def _pick_l_tile(L, c_for_sizing, itemsize, target_bytes=4 * 1024 * 1024):
    # Lane-dense tiles (multiples of 128 dividing L), sized so the largest
    # per-stream block is ~4 MiB (3 streams x 2 buffers fits 32 MiB scoped VMEM).
    if L % 128 != 0:
        return L  # full extent is always a legal block
    best = 128
    t = 128
    while t <= L:
        if L % t == 0 and c_for_sizing * t * itemsize <= target_bytes:
            best = t
        t += 128
    return best


def bn_silu_pallas(h, scale_bc, shift_bc, res_x=None, res_w=None, res_b=None):
    """silu(h * scale + shift) [+ residual].

    h: (B, C, L).  scale_bc / shift_bc: (B, C) folded per-(batch, channel)
    scalars (BatchNorm affine already combined with the optional time-embedding
    scale/shift).  Residual: identity (res_x with C channels) or fused 1x1 conv
    (res_x with C_in channels, res_w: (C, C_in[, 1]), res_b: (C,))."""
    B, C, L = h.shape
    f32 = jnp.float32
    sc3 = scale_bc.reshape(B, C, 1).astype(f32)
    sh3 = shift_bc.reshape(B, C, 1).astype(f32)

    c_tile = _pick_c_tile(C)
    if res_x is not None and res_w is not None:
        c_sizing = max(c_tile, res_x.shape[1])
    else:
        c_sizing = c_tile
    l_tile = _pick_l_tile(L, c_sizing, h.dtype.itemsize)
    n_c, n_l = C // c_tile, L // l_tile

    tile_spec = pl.BlockSpec((None, c_tile, l_tile), lambda c, b, t: (b, c, t))
    chan_spec = pl.BlockSpec((None, c_tile, 1), lambda c, b, t: (b, c, 0))

    mode = "plain"
    args = [h, sc3, sh3]
    in_specs = [tile_spec, chan_spec, chan_spec]
    if res_x is not None and res_w is None:
        mode = "res_identity"
        args.append(res_x)
        in_specs.append(tile_spec)
    elif res_x is not None:
        mode = "res_conv"
        C_in = res_x.shape[1]
        args += [res_x, res_w.reshape(C, C_in), res_b.reshape(C, 1)]
        in_specs += [
            pl.BlockSpec((None, C_in, l_tile), lambda c, b, t: (b, 0, t)),
            pl.BlockSpec((c_tile, C_in), lambda c, b, t: (c, 0)),
            pl.BlockSpec((c_tile, 1), lambda c, b, t: (c, 0)),
        ]

    return pl.pallas_call(
        _make_bn_silu_kernel(mode),
        out_shape=jax.ShapeDtypeStruct((B, C, L), h.dtype),
        grid_spec=pltpu.PrefetchScalarGridSpec(
            num_scalar_prefetch=0,
            grid=(n_c, B, n_l),
            in_specs=in_specs,
            out_specs=tile_spec,
        ),
        compiler_params=pltpu.CompilerParams(
            dimension_semantics=("parallel", "parallel", "arbitrary"),
            vmem_limit_bytes=_VMEM_LIMIT,
        ),
    )(*args)


def _fold_bn_affine(stats, gamma, beta, n, tscale=None, tshift=None):
    """Fold batch-stat BatchNorm + optional time-emb scale/shift into
    per-(batch, channel) scale/shift.  O(B*C) work, left to XLA.

    stats: (B, C, 2) per-batch partial (sum, sumsq) over L from the conv kernel.
    """
    s = jnp.sum(stats[..., 0], axis=0)
    sq = jnp.sum(stats[..., 1], axis=0)
    mean = s / n
    # NOTE: E[x^2]-E[x]^2 in f32 can cancel for large-mean/low-variance
    # channels; fine at these tolerances.  TODO(synk): Welford-style combine.
    var = sq / n - mean * mean                       # biased (training-mode BN)
    bn_scale = gamma * jax.lax.rsqrt(var + _EPS)
    bn_shift = beta - mean * bn_scale
    B = stats.shape[0]
    if tscale is not None:
        scale = bn_scale[None, :] * (tscale + 1.0)
        shift = bn_shift[None, :] * (tscale + 1.0) + tshift
    else:
        scale = jnp.broadcast_to(bn_scale[None, :], (B, bn_scale.shape[0]))
        shift = jnp.broadcast_to(bn_shift[None, :], (B, bn_shift.shape[0]))
    return scale, shift


# ---------------------------------------------------------------------------
# ResnetBlock module
# ---------------------------------------------------------------------------
class ResnetBlockPallas:
    """JAX/Pallas equivalent of ResnetBlock(dim, dim_out, time_emb_dim, dropout)."""

    def __init__(self, dim, dim_out, *, time_emb_dim=None, dropout=0.0, key=None):
        if key is None:
            key = jax.random.PRNGKey(0)
        ks = jax.random.split(key, 4)
        f32 = jnp.float32

        def conv_init(k, c_out, c_in, ksz):
            bound = 1.0 / math.sqrt(c_in * ksz)
            kw, kb = jax.random.split(k)
            w = jax.random.uniform(kw, (c_out, c_in, ksz), f32, -bound, bound)
            bb = jax.random.uniform(kb, (c_out,), f32, -bound, bound)
            return w, bb

        # block1 / block2 conv + BatchNorm params
        self.w1, self.b1 = conv_init(ks[0], dim_out, dim, 3)
        self.g1 = jnp.ones((dim_out,), f32)
        self.be1 = jnp.zeros((dim_out,), f32)
        self.w2, self.b2 = conv_init(ks[1], dim_out, dim_out, 3)
        self.g2 = jnp.ones((dim_out,), f32)
        self.be2 = jnp.zeros((dim_out,), f32)

        # time-embedding MLP
        self.has_mlp = time_emb_dim is not None
        if self.has_mlp:
            bound = 1.0 / math.sqrt(time_emb_dim)
            kw, kb = jax.random.split(ks[2])
            self.wt = jax.random.uniform(kw, (time_emb_dim, 2 * dim_out), f32,
                                         -bound, bound)
            self.bt = jax.random.uniform(kb, (2 * dim_out,), f32, -bound, bound)

        # residual 1x1 conv
        self.has_res_conv = dim != dim_out
        if self.has_res_conv:
            self.wr, self.br = conv_init(ks[3], dim_out, dim, 1)

        self.dim_out = dim_out
        # TODO(synk): stochastic (training-mode) Dropout not implemented;
        # reference default dropout=0.0 makes it the identity anyway.
        self.dropout = dropout

    def __call__(self, x, time_emb=None):
        B, _, L = x.shape
        tscale = tshift = None
        if self.has_mlp and time_emb is not None:
            # Tiny (B x D_t)@(D_t x 2C) matmul: plain XLA (a Pallas kernel here
            # is launch overhead); result is folded into bn1's per-(B,C) scalars.
            t = time_emb * jax.nn.sigmoid(time_emb)        # SiLU
            t = t @ self.wt + self.bt
            tscale = t[:, : self.dim_out]
            tshift = t[:, self.dim_out:]

        # block1: conv3 (+ BN stats) -> folded BN * (scale+1) + shift -> SiLU
        h, st1 = conv1d_stats_pallas(x, self.w1, self.b1)
        sc1, sh1 = _fold_bn_affine(st1, self.g1, self.be1, B * L, tscale, tshift)
        h = bn_silu_pallas(h, sc1, sh1)

        # block2: conv3 (+ BN stats) -> folded BN -> SiLU, residual fused in
        h2, st2 = conv1d_stats_pallas(h, self.w2, self.b2)
        sc2, sh2 = _fold_bn_affine(st2, self.g2, self.be2, B * L)
        if self.has_res_conv:
            return bn_silu_pallas(h2, sc2, sh2, res_x=x,
                                  res_w=self.wr, res_b=self.br)
        return bn_silu_pallas(h2, sc2, sh2, res_x=x)


# ---------------------------------------------------------------------------
# Pure-JAX reference (PyTorch semantics) for the correctness check
# ---------------------------------------------------------------------------
def _silu(x):
    return x * jax.nn.sigmoid(x)


def _conv1d_ref(x, w, b):
    B, C_in, L = x.shape
    C_out, _, K = w.shape
    pad = K // 2
    xp = jnp.pad(x, ((0, 0), (0, 0), (pad, pad)))
    out = jnp.zeros((B, C_out, L), jnp.float32)
    for k in range(K):
        out = out + jnp.einsum('oc,bcl->bol', w[:, :, k], xp[:, :, k:k + L])
    return out + b.reshape(1, C_out, 1)


def _bn_ref(x, g, bta):
    mean = jnp.mean(x, axis=(0, 2), keepdims=True)
    var = jnp.mean((x - mean) ** 2, axis=(0, 2), keepdims=True)
    xh = (x - mean) / jnp.sqrt(var + _EPS)
    return xh * g.reshape(1, -1, 1) + bta.reshape(1, -1, 1)


def resnet_block_ref(m, x, time_emb):
    scale_shift = None
    if m.has_mlp and time_emb is not None:
        t = _silu(time_emb) @ m.wt + m.bt
        scale = t[:, : m.dim_out][:, :, None]
        shift = t[:, m.dim_out:][:, :, None]
        scale_shift = (scale, shift)
    h = _conv1d_ref(x, m.w1, m.b1)
    h = _bn_ref(h, m.g1, m.be1)
    if scale_shift is not None:
        s, sh = scale_shift
        h = h * (s + 1) + sh
    h = _silu(h)
    h = _conv1d_ref(h, m.w2, m.b2)
    h = _bn_ref(h, m.g2, m.be2)
    h = _silu(h)
    res = _conv1d_ref(x, m.wr, m.br) if m.has_res_conv else x
    return h + res


if __name__ == "__main__":
    key = jax.random.PRNGKey(0)
    kx, kt, kp, kx2, kp2 = jax.random.split(key, 5)

    # Case 1: dim != dim_out (fused 1x1 res_conv) with time embedding.
    B, dim, dim_out, L, time_dim = 2, 4, 8, 16, 32
    x = jax.random.normal(kx, (B, dim, L), dtype=jnp.float32)
    time_emb = jax.random.normal(kt, (B, time_dim), dtype=jnp.float32)
    model = ResnetBlockPallas(dim, dim_out, time_emb_dim=time_dim, key=kp)
    out = jax.block_until_ready(model(x, time_emb))
    assert out.shape == (B, dim_out, L)
    ref = resnet_block_ref(model, x, time_emb)
    err1 = float(jnp.max(jnp.abs(out - ref)))
    assert jnp.allclose(out, ref, atol=1e-2, rtol=1e-2), err1

    # Case 2: dim == dim_out (identity residual), no time embedding.
    x2 = jax.random.normal(kx2, (B, dim_out, L), dtype=jnp.float32)
    model2 = ResnetBlockPallas(dim_out, dim_out, key=kp2)
    out2 = jax.block_until_ready(model2(x2))
    ref2 = resnet_block_ref(model2, x2, None)
    err2 = float(jnp.max(jnp.abs(out2 - ref2)))
    assert jnp.allclose(out2, ref2, atol=1e-2, rtol=1e-2), err2

    print("KERNEL_OK")
</pallas_src>

<mosaic_0001>
module attributes {stable_mosaic.version = 11 : i64} {
  func.func @kernel(%arg0: i32, %arg1: memref<1x4x16xf32, #tpu.memory_space<vmem>>, %arg2: memref<8x12xf32, #tpu.memory_space<vmem>>, %arg3: memref<8x1xf32, #tpu.memory_space<vmem>>, %arg4: memref<1x8x16xf32, #tpu.memory_space<vmem>>, %arg5: memref<1x8x2xf32, #tpu.memory_space<vmem>>) attributes {dimension_semantics = [#tpu.dimension_semantics<parallel>], iteration_bounds = array<i64: 2>, scalar_prefetch = 0 : i64, scratch_operands = 0 : i64, tpu.core_type = #tpu.core_type<tc>, window_params = [{transform_indices = @transform_0, window_bounds = array<i64: 1, 4, 16>}, {pipeline_mode = #tpu.pipeline_mode<synchronous>, transform_indices = @transform_1, window_bounds = array<i64: 8, 12>}, {pipeline_mode = #tpu.pipeline_mode<synchronous>, transform_indices = @transform_2, window_bounds = array<i64: 8, 1>}, {transform_indices = @transform_3, window_bounds = array<i64: 1, 8, 16>}, {transform_indices = @transform_4, window_bounds = array<i64: 1, 8, 2>}]} {
    %c0 = arith.constant 0 : index
    %c0_0 = arith.constant 0 : index
    %c0_1 = arith.constant 0 : index
    %0 = vector.load %arg1[%c0, %c0_0, %c0_1] : memref<1x4x16xf32, #tpu.memory_space<vmem>>, vector<1x4x16xf32>
    %1 = vector.shape_cast %0 : vector<1x4x16xf32> to vector<4x16xf32>
    %cst = arith.constant 0.000000e+00 : f32
    %2 = vector.broadcast %cst : f32 to vector<4x1xf32>
    %3 = vector.extract_strided_slice %1 {offsets = [0, 0], sizes = [4, 15], strides = [1, 1]} : vector<4x16xf32> to vector<4x15xf32>
    %4 = tpu.concatenate %2, %3 in 1 : vector<4x1xf32>, vector<4x15xf32> -> vector<4x16xf32>
    %cst_2 = arith.constant 0.000000e+00 : f32
    %5 = vector.broadcast %cst_2 : f32 to vector<4x1xf32>
    %6 = vector.extract_strided_slice %1 {offsets = [0, 1], sizes = [4, 15], strides = [1, 1]} : vector<4x16xf32> to vector<4x15xf32>
    %7 = tpu.concatenate %6, %5 in 1 : vector<4x15xf32>, vector<4x1xf32> -> vector<4x16xf32>
    %8 = tpu.concatenate %4, %1, %7 in 0 : vector<4x16xf32>, vector<4x16xf32>, vector<4x16xf32> -> vector<12x16xf32>
    %c0_3 = arith.constant 0 : index
    %c0_4 = arith.constant 0 : index
    %9 = vector.load %arg2[%c0_3, %c0_4] : memref<8x12xf32, #tpu.memory_space<vmem>>, vector<8x12xf32>
    %cst_5 = arith.constant dense<0.000000e+00> : vector<8x16xf32>
    %10 = tpu.matmul %9, %8, %cst_5 {dimension_numbers = #tpu.dot_dimension_numbers<[1], [0], [0], [1], [0, 0, 1, 1], [], []>} : vector<8x12xf32>, vector<12x16xf32>, vector<8x16xf32> -> vector<8x16xf32>
    %c0_6 = arith.constant 0 : index
    %c0_7 = arith.constant 0 : index
    %11 = vector.load %arg3[%c0_6, %c0_7] : memref<8x1xf32, #tpu.memory_space<vmem>>, vector<8x1xf32>
    %12 = vector.broadcast %11 : vector<8x1xf32> to vector<8x16xf32>
    %13 = arith.addf %10, %12 : vector<8x16xf32>
    %c0_8 = arith.constant 0 : index
    %c0_9 = arith.constant 0 : index
    %c0_10 = arith.constant 0 : index
    %14 = vector.load %arg4[%c0_8, %c0_9, %c0_10] : memref<1x8x16xf32, #tpu.memory_space<vmem>>, vector<1x8x16xf32>
    %15 = vector.shape_cast %14 : vector<1x8x16xf32> to vector<8x16xf32>
    %16 = vector.shape_cast %13 : vector<8x16xf32> to vector<1x8x16xf32>
    tpu.vector_store %arg4[%c0_8, %c0_9, %c0_10], %16 {strides = array<i32>} : memref<1x8x16xf32, #tpu.memory_space<vmem>>, vector<1x8x16xf32>,
    %cst_11 = arith.constant dense<0.000000e+00> : vector<8xf32>
    %17 = vector.multi_reduction <add>, %13, %cst_11 [1] : vector<8x16xf32> to vector<8xf32>
    %18 = vector.shape_cast %17 : vector<8xf32> to vector<8x1xf32>
    %19 = arith.mulf %13, %13 : vector<8x16xf32>
    %cst_12 = arith.constant dense<0.000000e+00> : vector<8xf32>
    %20 = vector.multi_reduction <add>, %19, %cst_12 [1] : vector<8x16xf32> to vector<8xf32>
    %21 = vector.shape_cast %20 : vector<8xf32> to vector<8x1xf32>
    %22 = tpu.concatenate %18, %21 in 1 : vector<8x1xf32>, vector<8x1xf32> -> vector<8x2xf32>
    %c0_13 = arith.constant 0 : index
    %c0_14 = arith.constant 0 : index
    %c0_15 = arith.constant 0 : index
    %23 = vector.load %arg5[%c0_13, %c0_14, %c0_15] : memref<1x8x2xf32, #tpu.memory_space<vmem>>, vector<1x8x2xf32>
    %24 = vector.shape_cast %23 : vector<1x8x2xf32> to vector<8x2xf32>
    %25 = vector.shape_cast %22 : vector<8x2xf32> to vector<1x8x2xf32>
    tpu.vector_store %arg5[%c0_13, %c0_14, %c0_15], %25 {strides = array<i32>} : memref<1x8x2xf32, #tpu.memory_space<vmem>>, vector<1x8x2xf32>,
    return
  }
  func.func @transform_0(%arg0: i32) -> (i32, i32, i32) {
    %c0_i32 = arith.constant 0 : i32
    %c0_i32_0 = arith.constant 0 : i32
    %c0_i32_1 = arith.constant 0 : i32
    return %arg0, %c0_i32, %c0_i32_0 : i32, i32, i32
  }
  func.func @transform_1(%arg0: i32) -> (i32, i32) {
    %c0_i32 = arith.constant 0 : i32
    %c0_i32_0 = arith.constant 0 : i32
    %c0_i32_1 = arith.constant 0 : i32
    return %c0_i32, %c0_i32_0 : i32, i32
  }
  func.func @transform_2(%arg0: i32) -> (i32, i32) {
    %c0_i32 = arith.constant 0 : i32
    %c0_i32_0 = arith.constant 0 : i32
    %c0_i32_1 = arith.constant 0 : i32
    return %c0_i32, %c0_i32_0 : i32, i32
  }
  func.func @transform_3(%arg0: i32) -> (i32, i32, i32) {
    %c0_i32 = arith.constant 0 : i32
    %c0_i32_0 = arith.constant 0 : i32
    %c0_i32_1 = arith.constant 0 : i32
    return %arg0, %c0_i32, %c0_i32_0 : i32, i32, i32
  }
  func.func @transform_4(%arg0: i32) -> (i32, i32, i32) {
    %c0_i32 = arith.constant 0 : i32
    %c0_i32_0 = arith.constant 0 : i32
    %c0_i32_1 = arith.constant 0 : i32
    return %arg0, %c0_i32, %c0_i32_0 : i32, i32, i32
  }
}

</mosaic_0001>

<bundles_post_ra>
// kernel: tpu_custom_call.1
= control target key start
LH: loop header
LB: loop body
LE: loop exit
PB: predicated region body
PF: predicated region fallthrough
CT: control target
= control target key end

     0   :  { %10 = vsyncpa [#allocation3], 0  ;;  %s700_s0 = inlined_call_operand.vmem [shape: f32[2,4,16], index: 0, kind: input, shape index: {}]   ;;  %s701_s1 = inlined_call_operand.hbm [shape: f32[8,12], index: 1, kind: input, shape index: {}]   ;;  %s702_s2 = inlined_call_operand.vmem [shape: f32[8,1], index: 2, kind: input, shape index: {}]   ;;  %s703_s3 = inlined_call_operand.hbm [shape: f32[2,8,16], index: 3, kind: output, shape index: {0}]   ;;  %s704_s4 = inlined_call_operand.vmem [shape: f32[2,8,2], index: 4, kind: output, shape index: {1}]  }
   0x1   :  { %11 = vsyncpa [#allocation4], 0 }
   0x2   :  { %13 = vsyncpa [#allocation4 + $0x1], 0  ;;  %s596_s15 = smov 0   ;;  %s598_s16 = smov 0  }
   0x3   :  { %s600_s17 = smov 0   ;;  %s602_s18 = smov 0  }
   0x4 LB: > { %s617_s19 = sadd.s32 4294967295, %s565_s18   ;;  %s399_s20 = sadd.s32 4294967294, %s565_s18   ;;  %s565_s18 = sphi %s602_s18, %s710_s18   ;;  %s561_s17 = sphi %s600_s17, %s709_s17   ;;  %s557_s16 = sphi %s598_s16, %s708_s16   ;;  %s553_s15 = sphi %s596_s15, %s707_s15  }
   0x5   : > { %s621_s21 = sadd.s32 1, %s565_s18   ;;  %s94_s22 = sadd.s32 1, %s561_s17 }
   0x6   : > { %s91_s23 = ssub.s32 %s565_s18, %s621_s21  ;;  %p104_p0 = scmp.ne.s32.totalorder %s561_s17, %s557_s16 }
   0x7   : > { %p92_p1 = scmp.eq.s32.totalorder %s91_s23, 0  ;;  %p105_p2 = scmp.eq.s32.totalorder %s617_s19, 1 }
   0x8   : > { %p110_p3 = scmp.ne.s32.totalorder %s557_s16, %s553_s15  ;;  %p111_p4 = scmp.eq.s32.totalorder %s399_s20, 1 }
   0x9   : > { %s632_s24 = scalar_select %p92_p1, %s561_s17, %s94_s22  }
   0xa   : > { %p634_p5 = por %p105_p2, %p104_p0  ;;  %p638_p6 = por %p111_p4, %p110_p3 }
   0xb   : > { %p400_p7 = scmp.ge.s32.totalorder %s565_s18, 1  ;;  %p144_p8 = scmp.lt.s32.totalorder %s565_s18, 3 }
   0xc   : > { %p428_p9 = scmp.eq.s32.totalorder %s617_s19, 0  ;;  %s156_s29 = sshll.u32 %s701_s1, 4  ;;  %s157_s29 = int_to_ptr.hbm [resolvable:$true] %s156_s29 }
   0xd   : > { %p145_p10 = pnand %p400_p7, %p144_p8  ;;  %s567_s30 = smov [#allocation2]  }
   0xe   : > { %s158_s5 = sshll.u32 %s567_s30, 4  ;;  %s159_s5 = int_to_ptr.vmem [resolvable:$true] %s158_s5 }
   0xf   : > { %p420_p11 = pneg %p145_p10  ;;  %181 = sbr.rel (%p145_p10) target bundleno = 404 (0x194), region = 32 }
  0x11   : > { %p421_p12 = pnand %p428_p9, %p420_p11 }
  0x13   : > { %423 = dma.hbm_to_vmem [thread:$0]  (!%p421_p12), %s157_s29, 128, %s159_s5, [#allocation3]  }
  0x14   : > { %544 = dma.done.wait (%p428_p9), [#allocation3], 128  }
  0x15   : > { %546 = vsyncadd (%p428_p9), [#allocation3], 4294967168  ;;  %p211_p13 = scmp.lt.s32.totalorder %s617_s19, 1  ;;  %s568_s11 = smov 127   ;;  %v236_v1 = vld [vmem:[%s702_s2] sm:$0xff]  ;;  %v570_v2 = vmov 0  }
  0x16   : > { %s569_s12 = smov 1   ;;  %467 = vset.pattern.permute.xlu1 %v570_v2  ;;  %468 = vset.pattern.permute.xlu0 %v570_v2  ;;  %vm229_vm0 = vcmask 121856   ;;  %vm233_vm1 = vcmask 1043456   ;;  %vm224_vm2 = vcmask 7168   ;;  %v235_v8 = vld [vmem:[#allocation2] sm:$0xff]  ;;  %vm242_vm3 = vcmask 97280  }
  0x17   : > { %s650_s6 = scalar_select %p211_p13, %s617_s19, 1  ;;  %239 = vperm.xlu1 %467, %v236_v1   ;;  %vm269_vm4 = vcmask 130048  }
  0x18   : > { %s202_s20 = sand.u32 1, %s557_s16   ;;  %s411_s22 = sshll.u32 %s617_s19, 3 }
  0x19   : > { %s406_s7 = sshll.u32 %s650_s6, 2  ;;  %s405_s23 = sshll.u32 %s202_s20, 3 }
  0x1a   : > { %s214_s10 = scalar_lea.vmem %s700_s0, %s406_s7  ;;  %s296_s29 = scalar_lea.hbm %s703_s3, %s411_s22 }
  0x1b   : > { %v219_v0 = vld [vmem:[%s214_s10] sm:$0xf]  ;;  %s204_s30 = scalar_lea.vmem [#allocation5], %s405_s23  ;;  %s300_s7 = sshll.u32 %s296_s29, 4  ;;  %s301_s7 = int_to_ptr.hbm [resolvable:$true] %s300_s7 }
  0x1c   : > { %226 = vrot.lane.b32.xlu0 %v219_v0, %s568_s11  ;;  %v231_v5 = vrot.slane %v219_v0, 4  ;;  %s298_s5 = sshll.u32 %s204_s30, 4  ;;  %s282_s19 = scalar_lea.sflag [#allocation4], %s202_s20  ;;  %s299_s5 = int_to_ptr.vmem [resolvable:$true] %s298_s5 }
  0x1d   : > { %s513_s8 = sshra.s32 %s301_s7, 4  ;;  %s514_s8 = int_to_ptr.hbm [resolvable:$true] %s513_s8 }
  0x1e   : > { %s515_s9 = scalar_lea.hbm %s514_s8, 8  ;;  %p520_p3 = scmp.lt.s32.totalorder %s514_s8, %s703_s3 }
  0x1f   : > { %p516_p0 = scmp.ne.s32.totalorder %s514_s8, %s515_s9 }
  0x21   : > { %p517_p1 = pnand %p516_p0, %p634_p5 }
  0x23   : > { %p518_p2 = pneg %p517_p1 }
  0x24   : > { %221 = vrot.lane.b32.xlu0 %v219_v0, %s569_s12  ;;  %s519_s12 = scalar_lea.hbm %s703_s3, 16 }
  0x25   : > { %p521_p4 = scmp.lt.s32.totalorder %s519_s12, %s515_s9 }
  0x27   : > { %p522_p7 = por %p521_p4, %p520_p3 }
  0x29   : > { %p523_p8 = pnand %p522_p7, %p518_p2 }
  0x89   : > { %v240_v10 = vpop.permute.xlu1 %239 }
  0x8e   : > { %v227_v3 = vpop.permute.xlu0 %226 }
  0x8f   : > { %v230_v4 = vsel %vm229_vm0, %v227_v3, 0.0 }
  0x90   : > { %408 = vmatpush.msk.msra.mxu0 %vm233_vm1, %v230_v4 }
  0x96   : > { %v222_v6 = vpop.permute.xlu0 %221 }
  0x97   : > { %v225_v7 = vsel %vm224_vm2, 0.0, %v222_v6 }
  0x98   : > { %v234_v9 = vsel %vm233_vm1, %v225_v7, %v231_v5 }
  0x99   : > { %264 = vmatpush.msra.mxu0 %v234_v9 }
  0x9a   : > { %409 = vmatmul.msk.f32.vlgmr.msra.gmra.mxu0 %vm242_vm3, %v235_v8 }
 0x117   : > { %v266_v11 = vpop.f32.mrf.mxu0 }
 0x118   : > { %v267_v12 = vadd.f32 %v266_v11, %v240_v10 }
 0x11a   : > { %v271_v13 = vsel %vm269_vm4, %v267_v12, 0.0  ;;  %v274_v14 = vmul.f32 %v267_v12, %v267_v12  ;;  %270 = vst.msk [vmem:[%s204_s30] sm:$0xff] %vm269_vm4, %v267_v12 }
 0x11b   : > { %272 = vadd.xlane.f32.xlu1 %v271_v13 }
 0x11c   : > { %526 = shalt.err (!%p523_p8)
}
 0x11d   : > { %418 = dma.vmem_to_hbm [thread:$0]  (%p634_p5), %s299_s5, 128, %s301_s7, %s282_s19   ;;  %v275_v15 = vsel %vm269_vm4, %v274_v14, 0.0  ;;  %vm279_vm5 = vcmask 15360  }
 0x11e   : > { %276 = vadd.xlane.f32.xlu2 %v275_v15  ;;  %s407_s20 = sshll.u32 %s650_s6, 3 }
 0x11f   : > { %s218_s27 = scalar_lea.vmem %s704_s4, %s407_s20 }
 0x18e   : > { %v273_v16 = vpop.xlane.xlu1 %272 }
 0x191   : > { %v277_v17 = vpop.xlane.xlu2 %276 }
 0x192   : > { %v278_v18 = vsel %vm224_vm2, %v273_v16, %v277_v17 }
 0x193   : > { %280 = vst.msk [vmem:[%s218_s27] sm:$0xff] %vm279_vm5, %v278_v18 }
 0x194 PF: > { %p430_p9 = scmp.ge.s32.totalorder %s565_s18, 2  ;;  %s315_s25 = sand.u32 1, %s553_s15  }
 0x195   : > { %s316_s6 = scalar_lea.sflag [#allocation4], %s315_s25 }
 0x196   : > { %p425_p5 = pnand %p430_p9, %p638_p6 }
 0x198   : > { %p426_p10 = pneg %p425_p5 }
 0x19a   : > { %548 = dma.done.wait (%p426_p10), %s316_s6, 128  }
 0x19b   : > { %550 = vsyncadd (%p426_p10), %s316_s6, 4294967168  ;;  %p16_p11 = scmp.ge.s32.totalorder %s621_s21, 4   ;;  %s707_s15 = smov %s557_s16 }
 0x19c   : > { %s708_s16 = smov %s561_s17  ;;  %s709_s17 = smov %s632_s24 }
 0x19d   : > { %s710_s18 = smov %s621_s21  ;;  %18 = sbr.rel (!%p16_p11) target bundleno = 4 (0x4), region = 84 }
 0x1a2   :  { %329 = vsyncpa [#allocation3], 1 }
 0x1a3   :  { %331 = vsyncpa [#allocation3 + $0x1], 1 }
 0x1a4   :  { %332 = vsyncpa [#allocation4], 1 }
 0x1a5   :  { %334 = vsyncpa [#allocation4 + $0x1], 1 }

</bundles_post_ra>
